<compile_context>
chip_gen: v5e
topology: v5e:2x2
jax: 0.10.0
libtpu: 0.0.40
codegen_flags: <defaults>
</compile_context>

<pallas_src>
import functools

import jax
import jax.numpy as jnp
from jax.experimental import pallas as pl
from jax.experimental.pallas import tpu as pltpu


def _round_up(x, m):
    return (x + m - 1) // m * m


# --------------------------------------------------------------------------
# Kernel
# --------------------------------------------------------------------------
def linear_kernel(x_ref, w_ref, b_ref, o_ref, acc_ref):
    # x_ref: [tm, tk] bf16, w_ref: [tk, tn] bf16, b_ref: [1, tn] f32,
    # o_ref: [tm, tn] out dtype, acc_ref: [tm, tn] f32 scratch.
    k = pl.program_id(2)

    prod = jnp.dot(x_ref[...], w_ref[...], preferred_element_type=jnp.float32)

    @pl.when(k == 0)
    def _init():
        # First K step writes the product directly — saves one full (tm,tn)
        # f32 store+load of the accumulator per output tile.
        acc_ref[...] = prod

    @pl.when(k > 0)
    def _accum():
        acc_ref[...] += prod

    @pl.when(k == pl.num_programs(2) - 1)
    def _finalize():
        # Bias added once, in the epilogue only.
        o_ref[...] = (acc_ref[...] + b_ref[...]).astype(o_ref.dtype)


# --------------------------------------------------------------------------
# Tile selection / VMEM budgeting
# --------------------------------------------------------------------------
def _choose_tiles(batch, in_features, out_features):
    """Pick (tm, tn, tk) per the perf guidance.

    - tm: clamp for small batch (bf16 sublane minimum 16), cap at 512.
    - tk/tn: 256-multiples (v6e/v7x MXU granularity), cap at 512; 128 for
      tiny dims (lane-dense minimum).
    - If the M axis collapses to one block, shrink tn so the N parallel axis
      has >=2 blocks when possible (v7x megacore).
    """
    tm = max(16, min(512, _round_up(batch, 16)))

    tk = 128 if in_features <= 128 else min(512, _round_up(in_features, 256))
    tn = 128 if out_features <= 128 else min(512, _round_up(out_features, 256))

    bp = _round_up(batch, tm)
    if bp // tm == 1:
        # Try to give megacore >=2 blocks along N.
        while tn > 128 and _round_up(out_features, tn) // tn < 2:
            tn //= 2
    return tm, tn, tk


def _vmem_limit_bytes(tm, tn, tk, out_bytes):
    per_step = (
        2 * tm * tk * 2        # x tile, bf16, double buffered
        + 2 * tk * tn * 2      # w tile, bf16, double buffered
        + 2 * 1 * tn * 4       # bias tile, f32, double buffered
        + 2 * tm * tn * out_bytes  # output tile, double buffered
        + tm * tn * 4          # f32 accumulator scratch
    )
    limit = 2 * per_step + (8 << 20)     # 2x headroom + 8 MiB slack
    # Clamp: >=32 MiB (default scoped), <=48 MiB (safe on v7x's 64 MiB VMEM).
    return max(32 << 20, min(limit, 48 << 20))


# --------------------------------------------------------------------------
# Parameter preparation (hoisted out of the per-call path)
# --------------------------------------------------------------------------
def prepare_linear_params(w, b, *, tn, tk):
    """Cast + pad weights/bias once.  Call this once per model, not per step."""
    in_features, out_features = w.shape
    in_p = _round_up(in_features, tk)
    out_p = _round_up(out_features, tn)

    wp = w.astype(jnp.bfloat16)
    if (in_p, out_p) != (in_features, out_features):
        wp = jnp.zeros((in_p, out_p), jnp.bfloat16).at[
            :in_features, :out_features].set(wp)

    bp = b.astype(jnp.float32).reshape(1, out_features)
    if out_p != out_features:
        bp = jnp.zeros((1, out_p), jnp.float32).at[:, :out_features].set(bp)

    return wp, bp


# --------------------------------------------------------------------------
# Forward (params already prepared)
# --------------------------------------------------------------------------
@functools.partial(jax.jit, static_argnames=("out_features", "tm", "tn", "tk"))
def linear_forward_prepared(x, wp, bp, *, out_features, tm, tn, tk):
    """y = x @ w + b with pre-padded bf16 weights `wp` and f32 bias `bp`."""
    batch, in_features = x.shape
    in_p, out_p = wp.shape
    out_dtype = x.dtype

    batch_p = _round_up(batch, tm)
    xp = x if x.dtype == jnp.bfloat16 else x.astype(jnp.bfloat16)
    if (batch_p, in_p) != (batch, in_features):
        xp = jnp.zeros((batch_p, in_p), jnp.bfloat16).at[
            :batch, :in_features].set(xp)

    grid = (batch_p // tm, out_p // tn, in_p // tk)  # (M, N, K) — K last.

    out_padded = pl.pallas_call(
        linear_kernel,
        out_shape=jax.ShapeDtypeStruct((batch_p, out_p), out_dtype),
        grid=grid,
        in_specs=[
            pl.BlockSpec((tm, tk), lambda i, j, k: (i, k)),   # x tile
            pl.BlockSpec((tk, tn), lambda i, j, k: (k, j)),   # w tile
            pl.BlockSpec((1, tn), lambda i, j, k: (0, j)),    # bias tile
        ],
        out_specs=pl.BlockSpec((tm, tn), lambda i, j, k: (i, j)),
        scratch_shapes=[pltpu.VMEM((tm, tn), jnp.float32)],
        compiler_params=pltpu.CompilerParams(
            dimension_semantics=("parallel", "parallel", "arbitrary"),
            vmem_limit_bytes=_vmem_limit_bytes(
                tm, tn, tk, jnp.dtype(out_dtype).itemsize),
        ),
    )(xp, wp, bp)

    return out_padded[:batch, :out_features]


def linear_forward(x, w, b):
    """Convenience one-shot wrapper (prep + forward).  Prefer calling
    `prepare_linear_params` once and `linear_forward_prepared` per step."""
    batch, in_features = x.shape
    _, out_features = w.shape
    tm, tn, tk = _choose_tiles(batch, in_features, out_features)
    wp, bp = prepare_linear_params(w, b, tn=tn, tk=tk)
    return linear_forward_prepared(
        x, wp, bp, out_features=out_features, tm=tm, tn=tn, tk=tk)


if __name__ == "__main__":
    # Deterministic parameter / input construction (mirrors t.randn init).
    key = jax.random.PRNGKey(0)
    k_x, k_w, k_b = jax.random.split(key, 3)

    batch = 2
    in_features = 3      # matches the reference `input = t.randn(1, 3)`
    out_features = 16

    x = jax.random.normal(k_x, (batch, in_features), dtype=jnp.float32)
    w = jax.random.normal(k_w, (in_features, out_features), dtype=jnp.float32)
    b = jax.random.normal(k_b, (out_features,), dtype=jnp.float32)

    # Hoist the weight/bias prep out of the per-call path (done once).
    tm, tn, tk = _choose_tiles(batch, in_features, out_features)
    wp, bp = prepare_linear_params(w, b, tn=tn, tk=tk)

    y = linear_forward_prepared(
        x, wp, bp, out_features=out_features, tm=tm, tn=tn, tk=tk)
    jax.block_until_ready(y)

    # Reference uses the same bf16-quantized inputs the kernel feeds the MXU,
    # with f32 accumulation — so the comparison can stay tight.
    x_q = x.astype(jnp.bfloat16).astype(jnp.float32)
    w_q = w.astype(jnp.bfloat16).astype(jnp.float32)
    y_ref = x_q @ w_q + b[None, :]

    assert y.shape == (batch, out_features)
    assert jnp.allclose(y, y_ref, atol=1e-4, rtol=1e-4), (
        jnp.max(jnp.abs(y - y_ref)))

    # TODO(synk): the PyTorch forward also print()s the bias; debug printing
    # is omitted (could be pl.debug_print, but it is not part of the math).
    print("KERNEL_OK")
</pallas_src>

<mosaic_0001>
module attributes {stable_mosaic.version = 11 : i64} {
  func.func @linear_kernel(%arg0: i32, %arg1: i32, %arg2: i32, %arg3: memref<16x128xbf16, #tpu.memory_space<vmem>>, %arg4: memref<128x128xbf16, #tpu.memory_space<vmem>>, %arg5: memref<1x128xf32, #tpu.memory_space<vmem>>, %arg6: memref<16x128xf32, #tpu.memory_space<vmem>>, %arg7: memref<16x128xf32, #tpu.memory_space<vmem>>) attributes {dimension_semantics = [#tpu.dimension_semantics<parallel>, #tpu.dimension_semantics<parallel>, #tpu.dimension_semantics<arbitrary>], iteration_bounds = array<i64: 1, 1, 1>, scalar_prefetch = 0 : i64, scratch_operands = 1 : i64, tpu.core_type = #tpu.core_type<tc>, window_params = [{transform_indices = @transform_0, window_bounds = array<i64: 16, 128>}, {transform_indices = @transform_1, window_bounds = array<i64: 128, 128>}, {transform_indices = @transform_2, window_bounds = array<i64: 1, 128>}, {transform_indices = @transform_3, window_bounds = array<i64: 16, 128>}]} {
    %c0 = arith.constant 0 : index
    %c0_0 = arith.constant 0 : index
    %0 = vector.load %arg3[%c0, %c0_0] : memref<16x128xbf16, #tpu.memory_space<vmem>>, vector<16x128xbf16>
    %c0_1 = arith.constant 0 : index
    %c0_2 = arith.constant 0 : index
    %1 = vector.load %arg4[%c0_1, %c0_2] : memref<128x128xbf16, #tpu.memory_space<vmem>>, vector<128x128xbf16>
    %cst = arith.constant dense<0.000000e+00> : vector<16x128xf32>
    %2 = tpu.matmul %0, %1, %cst {dimension_numbers = #tpu.dot_dimension_numbers<[1], [0], [0], [1], [0, 0, 1, 1], [], []>} : vector<16x128xbf16>, vector<128x128xbf16>, vector<16x128xf32> -> vector<16x128xf32>
    %c0_i32 = arith.constant 0 : i32
    %3 = arith.cmpi eq, %arg2, %c0_i32 : i32
    %4 = arith.extui %3 : i1 to i32
    %c0_i32_3 = arith.constant 0 : i32
    %5 = arith.cmpi ne, %4, %c0_i32_3 : i32
    scf.if %5 {
      %c0_8 = arith.constant 0 : index
      %c0_9 = arith.constant 0 : index
      %12 = vector.load %arg7[%c0_8, %c0_9] : memref<16x128xf32, #tpu.memory_space<vmem>>, vector<16x128xf32>
      tpu.vector_store %arg7[%c0_8, %c0_9], %2 {strides = array<i32>} : memref<16x128xf32, #tpu.memory_space<vmem>>, vector<16x128xf32>,
    } else {
    }
    %c0_i32_4 = arith.constant 0 : i32
    %6 = arith.cmpi sgt, %arg2, %c0_i32_4 : i32
    %7 = arith.extui %6 : i1 to i32
    %c0_i32_5 = arith.constant 0 : i32
    %8 = arith.cmpi ne, %7, %c0_i32_5 : i32
    scf.if %8 {
      %c0_8 = arith.constant 0 : index
      %c0_9 = arith.constant 0 : index
      %12 = vector.load %arg7[%c0_8, %c0_9] : memref<16x128xf32, #tpu.memory_space<vmem>>, vector<16x128xf32>
      %13 = arith.addf %12, %2 : vector<16x128xf32>
      %c0_10 = arith.constant 0 : index
      %c0_11 = arith.constant 0 : index
      %14 = vector.load %arg7[%c0_10, %c0_11] : memref<16x128xf32, #tpu.memory_space<vmem>>, vector<16x128xf32>
      tpu.vector_store %arg7[%c0_10, %c0_11], %13 {strides = array<i32>} : memref<16x128xf32, #tpu.memory_space<vmem>>, vector<16x128xf32>,
    } else {
    }
    %c0_i32_6 = arith.constant 0 : i32
    %9 = arith.cmpi eq, %arg2, %c0_i32_6 : i32
    %10 = arith.extui %9 : i1 to i32
    %c0_i32_7 = arith.constant 0 : i32
    %11 = arith.cmpi ne, %10, %c0_i32_7 : i32
    scf.if %11 {
      %c0_8 = arith.constant 0 : index
      %c0_9 = arith.constant 0 : index
      %12 = vector.load %arg7[%c0_8, %c0_9] : memref<16x128xf32, #tpu.memory_space<vmem>>, vector<16x128xf32>
      %c0_10 = arith.constant 0 : index
      %c0_11 = arith.constant 0 : index
      %13 = vector.load %arg5[%c0_10, %c0_11] : memref<1x128xf32, #tpu.memory_space<vmem>>, vector<1x128xf32>
      %14 = vector.broadcast %13 : vector<1x128xf32> to vector<16x128xf32>
      %15 = arith.addf %12, %14 : vector<16x128xf32>
      %c0_12 = arith.constant 0 : index
      %c0_13 = arith.constant 0 : index
      %16 = vector.load %arg6[%c0_12, %c0_13] : memref<16x128xf32, #tpu.memory_space<vmem>>, vector<16x128xf32>
      tpu.vector_store %arg6[%c0_12, %c0_13], %15 {strides = array<i32>} : memref<16x128xf32, #tpu.memory_space<vmem>>, vector<16x128xf32>,
    } else {
    }
    return
  }
  func.func @transform_0(%arg0: i32, %arg1: i32, %arg2: i32) -> (i32, i32) {
    %c0_i32 = arith.constant 0 : i32
    return %arg0, %arg2 : i32, i32
  }
  func.func @transform_1(%arg0: i32, %arg1: i32, %arg2: i32) -> (i32, i32) {
    %c0_i32 = arith.constant 0 : i32
    return %arg2, %arg1 : i32, i32
  }
  func.func @transform_2(%arg0: i32, %arg1: i32, %arg2: i32) -> (i32, i32) {
    %c0_i32 = arith.constant 0 : i32
    %c0_i32_0 = arith.constant 0 : i32
    return %c0_i32, %arg1 : i32, i32
  }
  func.func @transform_3(%arg0: i32, %arg1: i32, %arg2: i32) -> (i32, i32) {
    %c0_i32 = arith.constant 0 : i32
    return %arg0, %arg1 : i32, i32
  }
}

</mosaic_0001>

<bundles_post_ra>
// kernel: linear_forward_prepared.1
= control target key start
LH: loop header
LB: loop body
LE: loop exit
PB: predicated region body
PF: predicated region fallthrough
CT: control target
= control target key end

     0   :  { %8 = vsyncpa [#allocation4], 0  ;;  %s225_s15 = smov [#allocation3]   ;;  %s226_s17 = smov 64   ;;  %s263_s0 = inlined_call_operand.vmem [shape: bf16[16,128], index: 0, kind: input, shape index: {}]   ;;  %s264_s1 = inlined_call_operand.hbm [shape: bf16[128,128], index: 1, kind: input, shape index: {}]   ;;  %s265_s2 = inlined_call_operand.vmem [shape: f32[1,128], index: 2, kind: input, shape index: {}]   ;;  %s266_s3 = inlined_call_operand.vmem [shape: f32[16,128], index: 3, kind: output, shape index: {}]  }
   0x1   :  { %s15_s14 = sshll.u32 %s264_s1, 4  ;;  %s17_s16 = sshll.u32 %s225_s15, 4  ;;  %s16_s14 = int_to_ptr.hbm [resolvable:$true] %s15_s14  ;;  %s18_s16 = int_to_ptr.vmem [resolvable:$true] %s17_s16 }
   0x2   :  { %s227_s18 = smov 4  }
   0x3   :  { %23 = dma.hbm_to_vmem [thread:$0]  %s16_s14, 1024, %s18_s16, [#allocation4], %s226_s17, %s226_s17, %s227_s18  }
   0x4   :  { %223 = dma.done.wait [#allocation4], 1024  }
   0x5   :  { %224 = vsyncadd [#allocation4], 4294966272  ;;  %v194_v0 = vld [vmem:[#allocation3 + $0x38] sm:$0xff]  ;;  %v193_v1 = vld [vmem:[#allocation3 + $0x30] sm:$0xff] }
   0x6   :  { %102 = vmatpush.bf16.msra.mxu0 %v194_v0  ;;  %v192_v2 = vld [vmem:[#allocation3 + $0x28] sm:$0xff]  ;;  %v191_v3 = vld [vmem:[#allocation3 + $0x20] sm:$0xff]  ;;  %v190_v4 = vld [vmem:[#allocation3 + $0x18] sm:$0xff] }
   0x7   :  { %v189_v5 = vld [vmem:[#allocation3 + $0x10] sm:$0xff]  ;;  %v188_v6 = vld [vmem:[#allocation3 + $0x8] sm:$0xff]  ;;  %v187_v7 = vld [vmem:[#allocation3] sm:$0xff] }
   0x8   :  { %v186_v8 = vld [vmem:[%s263_s0] sm:$0xff] }
   0x9   :  { %v198_v9 = vld [vmem:[%s265_s2] ss:$0 sm:$0xff] }
   0xa   :  { %103 = vmatpush.bf16.msra.mxu0 %v193_v1 }
   0xe   :  { %104 = vmatpush.bf16.msra.mxu0 %v192_v2 }
  0x12   :  { %105 = vmatpush.bf16.msra.mxu0 %v191_v3 }
  0x16   :  { %106 = vmatpush.bf16.msra.mxu0 %v190_v4 }
  0x1a   :  { %107 = vmatpush.bf16.msra.mxu0 %v189_v5 }
  0x1e   :  { %108 = vmatpush.bf16.msra.mxu0 %v188_v6 }
  0x22   :  { %109 = vmatpush.bf16.msra.mxu0 %v187_v7 }
  0x25   :  { %110 = vmatmul.bf16.vlgmr.msra.gmra.mxu0 %v186_v8 }
  0xa2   :  { %v111_v10 = vpop.f32.mrf.mxu0 }
  0xa3   :  { %v141_v11 = vadd.f32 %v198_v9, %v111_v10 }
  0xa5   :  { %143 = vst [vmem:[%s266_s3] sm:$0xff] %v141_v11 }
  0xaa   :  { %v113_v12 = vpop.f32.mrf.mxu0 }
  0xab   :  { %v142_v13 = vadd.f32 %v198_v9, %v113_v12 }
  0xad   :  { %144 = vst [vmem:[%s266_s3 + $0x8] sm:$0xff] %v142_v13 }
  0xae   :  { %149 = vsyncpa [#allocation4], 1 }

</bundles_post_ra>
